<compile_context>
chip_gen: v6e
topology: v6e:2x2x1
jax: 0.10.0
libtpu: 0.0.40
codegen_flags: <defaults>
</compile_context>

<pallas_src>
import functools

import jax
import jax.numpy as jnp
from jax.experimental import pallas as pl
from jax.experimental.pallas import tpu as pltpu


def _mhsa_kernel(x_ref, wqkv_ref, bqkv_ref, wo_ref, bo_ref, o_ref, *,
                 num_heads, head_dim, eps):
    batch_block, S, _ = x_ref.shape
    EP = o_ref.shape[-1]
    D = head_dim

    # Loop-invariant load, hoisted once per grid step.
    bo = bo_ref[...]                                           # (1, EP) f32

    def seq_body(bi, carry):
        x = x_ref[bi].astype(jnp.float32)                      # (S, E)

        # LayerNorm statistics only (gamma/beta are folded into the weights).
        # var = E[x^2] - E[x]^2 -> both reductions issue directly from x.
        mean = jnp.mean(x, axis=-1, keepdims=True)
        mean_sq = jnp.mean(x * x, axis=-1, keepdims=True)
        var = mean_sq - mean * mean
        xn = (x - mean) * jax.lax.rsqrt(var + eps)             # (S, E) f32
        xn_b = xn.astype(jnp.bfloat16)                         # MXU operand

        def head_body(h, acc):
            # One fused QKV matmul per head (N = 3D instead of three N = D).
            qkv = jnp.dot(xn_b, wqkv_ref[h],
                          preferred_element_type=jnp.float32) + bqkv_ref[h]  # (S, 3D)
            q = qkv[:, :D].astype(jnp.bfloat16)
            k = qkv[:, D:2 * D].astype(jnp.bfloat16)
            v = qkv[:, 2 * D:].astype(jnp.bfloat16)

            # scores = q @ k^T (1/sqrt(D) is folded into the q weights/bias).
            scores = jax.lax.dot_general(
                q, k, (((1,), (1,)), ((), ())),
                preferred_element_type=jnp.float32)            # (S, S) f32
            m = jnp.max(scores, axis=-1, keepdims=True)
            p = jnp.exp(scores - m)
            inv = 1.0 / jnp.sum(p, axis=-1, keepdims=True)     # exact reciprocal

            # Normalize after the PV matmul: S*D multiplies instead of S*S.
            ctx = jnp.dot(p.astype(jnp.bfloat16), v,
                          preferred_element_type=jnp.float32) * inv          # (S, D)

            # Per-head out-projection rows accumulated into the lane-dense slab.
            # (A single fused (S,E)@(E,EP) matmul only pays off when D%128==0.)
            return acc + jnp.dot(ctx.astype(jnp.bfloat16), wo_ref[h],
                                 preferred_element_type=jnp.float32)         # (S, EP)

        acc = jax.lax.fori_loop(0, num_heads, head_body,
                                jnp.zeros((S, EP), jnp.float32))
        o_ref[bi] = (acc + bo).astype(o_ref.dtype)
        return carry

    jax.lax.fori_loop(0, batch_block, seq_body, 0)


def mhsa_block(x, gamma, beta, in_proj_w, in_proj_b, out_proj_w, out_proj_b,
               *, num_heads, eps=1e-5, batch_block=None):
    """x: (B, S, E) float32.  Parameters follow the torch module layout:
       gamma/beta: (E,), in_proj_w: (3E, E), in_proj_b: (3E,),
       out_proj_w: (E, E), out_proj_b: (E,)."""
    B, S, E = x.shape
    H = num_heads
    assert E % H == 0
    D = E // H
    assert S % 8 == 0, "pad S to a multiple of 8 (sublane) before calling"
    scale = 1.0 / (D ** 0.5)
    EP = E if E % 128 == 0 else ((E + 127) // 128) * 128

    f32 = jnp.float32
    gamma, beta = gamma.astype(f32), beta.astype(f32)
    in_proj_w, in_proj_b = in_proj_w.astype(f32), in_proj_b.astype(f32)
    out_proj_w, out_proj_b = out_proj_w.astype(f32), out_proj_b.astype(f32)

    # ---- fold LayerNorm affine and the 1/sqrt(D) scale into the projections ----
    w_in_t = jnp.transpose(in_proj_w)                   # (E, 3E), input-major
    w_fold = gamma[:, None] * w_in_t                    # fold LN gamma (per input row)
    b_fold = in_proj_b + beta @ w_in_t                  # fold LN beta, (3E,)

    def heads(wcols, bcols):                            # (E,E)->(E,H,D), (E,)->(H,D)
        return wcols.reshape(E, H, D), bcols.reshape(H, D)

    wq, bq = heads(w_fold[:, :E] * scale, b_fold[:E] * scale)   # fold 1/sqrt(D)
    wk, bk = heads(w_fold[:, E:2 * E], b_fold[E:2 * E])
    wv, bv = heads(w_fold[:, 2 * E:], b_fold[2 * E:])
    # Lane-dense fused per-head QKV weights (bf16) and biases (f32).
    wqkv = jnp.transpose(jnp.concatenate([wq, wk, wv], axis=-1),
                         (1, 0, 2)).astype(jnp.bfloat16)         # (H, E, 3D)
    bqkv = jnp.concatenate([bq, bk, bv], axis=-1)[:, None, :]    # (H, 1, 3D) f32

    # ---- per-head output-projection rows, lane-padded to EP, bf16 ----
    wo_t = jnp.transpose(out_proj_w)                    # (E, E) rows = concat-head dim
    wo_pad = jnp.zeros((E, EP), f32).at[:, :E].set(wo_t)
    wo_heads = wo_pad.reshape(H, D, EP).astype(jnp.bfloat16)     # (H, D, EP)
    bo_pad = jnp.zeros((1, EP), f32).at[0, :E].set(out_proj_b)

    # ---- grid: keep a real batch grid (pipelining / megacore), ~2 MiB / step ----
    if batch_block is None:
        per_seq_bytes = S * (E + EP) * 4
        bb = max(1, (1 << 21) // per_seq_bytes)         # ~2 MiB of x + out per step
        min_steps = min(B, 4)                           # keep the pipeline fed
        bb = min(bb, max(1, B // min_steps))
    else:
        bb = batch_block
    bb = max(1, min(bb, B))
    while B % bb:
        bb -= 1
    G = B // bb

    kernel = functools.partial(_mhsa_kernel, num_heads=H, head_dim=D, eps=eps)

    params = pltpu.CompilerParams(
        dimension_semantics=("parallel",),
        vmem_limit_bytes=32 * 1024 * 1024)

    def build(weight_mode):
        def const_spec(shape):
            idx = lambda g: (0,) * len(shape)
            if weight_mode is None:
                return pl.BlockSpec(shape, idx)
            return pl.BlockSpec(shape, idx, pipeline_mode=weight_mode)

        return pl.pallas_call(
            kernel,
            out_shape=jax.ShapeDtypeStruct((B, S, EP), x.dtype),
            grid_spec=pltpu.PrefetchScalarGridSpec(
                num_scalar_prefetch=0,
                grid=(G,),
                in_specs=[
                    pl.BlockSpec((bb, S, E), lambda g: (g, 0, 0)),    # x
                    const_spec(wqkv.shape),      # (H, E, 3D) bf16
                    const_spec(bqkv.shape),      # (H, 1, 3D) f32
                    const_spec(wo_heads.shape),  # (H, D, EP) bf16
                    const_spec(bo_pad.shape),    # (1, EP)    f32
                ],
                out_specs=pl.BlockSpec((bb, S, EP), lambda g: (g, 0, 0)),
            ),
            compiler_params=params,
        )

    args = (x, wqkv, bqkv, wo_heads, bo_pad)
    try:
        # Grid-invariant weights: request single buffering (halves weight VMEM).
        out_padded = build(pl.Buffered(1))(*args)
    except Exception:
        out_padded = build(None)(*args)

    if EP == E:
        return out_padded
    # TODO(synk): for mem-bound shapes consider returning the padded slab to the
    # consumer; this slice is one extra HBM pass over the output.
    return out_padded[..., :E]


def _reference(x, gamma, beta, in_proj_w, in_proj_b, out_proj_w, out_proj_b,
               *, num_heads, eps=1e-5):
    """Pure-JAX f32 reference mirroring torch LayerNorm + MultiheadAttention."""
    B, S, E = x.shape
    D = E // num_heads
    mean = jnp.mean(x, axis=-1, keepdims=True)
    var = jnp.mean((x - mean) ** 2, axis=-1, keepdims=True)
    xn = (x - mean) / jnp.sqrt(var + eps) * gamma + beta
    qkv = jnp.einsum('bse,fe->bsf', xn, in_proj_w) + in_proj_b
    q, k, v = jnp.split(qkv, 3, axis=-1)
    q = q.reshape(B, S, num_heads, D)
    k = k.reshape(B, S, num_heads, D)
    v = v.reshape(B, S, num_heads, D)
    scores = jnp.einsum('bqhd,bkhd->bhqk', q, k) / (D ** 0.5)
    p = jax.nn.softmax(scores, axis=-1)
    ctx = jnp.einsum('bhqk,bkhd->bqhd', p, v).reshape(B, S, E)
    return jnp.einsum('bse,fe->bsf', ctx, out_proj_w) + out_proj_b


if __name__ == "__main__":
    B, S, E, H = 2, 8, 32, 4

    key = jax.random.PRNGKey(0)
    kx, kw1, kb1, kw2, kb2, kg = jax.random.split(key, 6)

    x = jax.random.normal(kx, (B, S, E), dtype=jnp.float32)

    # Deterministic synthetic parameters (shapes match the torch module).
    gamma = 1.0 + 0.01 * jax.random.normal(kg, (E,), dtype=jnp.float32)
    beta = 0.01 * jax.random.normal(kb2, (E,), dtype=jnp.float32)
    in_proj_w = 0.05 * jax.random.normal(kw1, (3 * E, E), dtype=jnp.float32)
    in_proj_b = 0.01 * jax.random.normal(kb1, (3 * E,), dtype=jnp.float32)
    out_proj_w = 0.05 * jax.random.normal(kw2, (E, E), dtype=jnp.float32)
    out_proj_b = jnp.zeros((E,), dtype=jnp.float32)

    out = mhsa_block(x, gamma, beta, in_proj_w, in_proj_b, out_proj_w,
                     out_proj_b, num_heads=H)
    out = jax.block_until_ready(out)

    ref = _reference(x, gamma, beta, in_proj_w, in_proj_b, out_proj_w,
                     out_proj_b, num_heads=H)

    assert out.shape == (B, S, E)
    assert bool(jnp.all(jnp.isfinite(out)))
    # Softmax reciprocal is exact; remaining error is bf16 MXU-operand rounding
    # (f32 accumulation), well inside this tolerance at these magnitudes.
    assert jnp.allclose(out, ref, atol=5e-3, rtol=5e-3)
    print("KERNEL_OK")
</pallas_src>

<mosaic_0001>
module attributes {stable_mosaic.version = 11 : i64} {
  func.func @_mhsa_kernel(%arg0: i32, %arg1: memref<1x8x32xf32, #tpu.memory_space<vmem>>, %arg2: memref<4x32x24xbf16, #tpu.memory_space<vmem>>, %arg3: memref<4x1x24xf32, #tpu.memory_space<vmem>>, %arg4: memref<4x8x128xbf16, #tpu.memory_space<vmem>>, %arg5: memref<1x128xf32, #tpu.memory_space<vmem>>, %arg6: memref<1x8x128xf32, #tpu.memory_space<vmem>>) attributes {dimension_semantics = [#tpu.dimension_semantics<parallel>], iteration_bounds = array<i64: 2>, scalar_prefetch = 0 : i64, scratch_operands = 0 : i64, tpu.core_type = #tpu.core_type<tc>, window_params = [{transform_indices = @transform_0, window_bounds = array<i64: 1, 8, 32>}, {pipeline_mode = #tpu.pipeline_mode<synchronous>, transform_indices = @transform_1, window_bounds = array<i64: 4, 32, 24>}, {pipeline_mode = #tpu.pipeline_mode<synchronous>, transform_indices = @transform_2, window_bounds = array<i64: 4, 1, 24>}, {pipeline_mode = #tpu.pipeline_mode<synchronous>, transform_indices = @transform_3, window_bounds = array<i64: 4, 8, 128>}, {pipeline_mode = #tpu.pipeline_mode<synchronous>, transform_indices = @transform_4, window_bounds = array<i64: 1, 128>}, {transform_indices = @transform_5, window_bounds = array<i64: 1, 8, 128>}]} {
    %c0 = arith.constant 0 : index
    %c0_0 = arith.constant 0 : index
    %0 = vector.load %arg5[%c0, %c0_0] : memref<1x128xf32, #tpu.memory_space<vmem>>, vector<1x128xf32>
    %c0_i32 = arith.constant 0 : i32
    %1 = arith.index_cast %c0_i32 : i32 to index
    %c0_1 = arith.constant 0 : index
    %c0_2 = arith.constant 0 : index
    %2 = vector.load %arg1[%1, %c0_1, %c0_2] : memref<1x8x32xf32, #tpu.memory_space<vmem>>, vector<1x8x32xf32>
    %3 = vector.shape_cast %2 : vector<1x8x32xf32> to vector<8x32xf32>
    %cst = arith.constant dense<0.000000e+00> : vector<8xf32>
    %4 = vector.multi_reduction <add>, %3, %cst [1] : vector<8x32xf32> to vector<8xf32>
    %5 = vector.shape_cast %4 : vector<8xf32> to vector<8x1xf32>
    %cst_3 = arith.constant 3.200000e+01 : f32
    %6 = vector.broadcast %cst_3 : f32 to vector<8x1xf32>
    %7 = arith.divf %5, %6 : vector<8x1xf32>
    %8 = arith.mulf %3, %3 : vector<8x32xf32>
    %cst_4 = arith.constant dense<0.000000e+00> : vector<8xf32>
    %9 = vector.multi_reduction <add>, %8, %cst_4 [1] : vector<8x32xf32> to vector<8xf32>
    %10 = vector.shape_cast %9 : vector<8xf32> to vector<8x1xf32>
    %cst_5 = arith.constant 3.200000e+01 : f32
    %11 = vector.broadcast %cst_5 : f32 to vector<8x1xf32>
    %12 = arith.divf %10, %11 : vector<8x1xf32>
    %13 = arith.mulf %7, %7 : vector<8x1xf32>
    %14 = arith.subf %12, %13 : vector<8x1xf32>
    %15 = vector.broadcast %7 : vector<8x1xf32> to vector<8x32xf32>
    %16 = arith.subf %3, %15 : vector<8x32xf32>
    %cst_6 = arith.constant 9.99999974E-6 : f32
    %17 = vector.broadcast %cst_6 : f32 to vector<8x1xf32>
    %18 = arith.addf %14, %17 : vector<8x1xf32>
    %19 = math.rsqrt %18 : vector<8x1xf32>
    %20 = vector.broadcast %19 : vector<8x1xf32> to vector<8x32xf32>
    %21 = arith.mulf %16, %20 : vector<8x32xf32>
    %22 = arith.truncf %21 : vector<8x32xf32> to vector<8x32xbf16>
    %cst_7 = arith.constant 0.000000e+00 : f32
    %23 = vector.broadcast %cst_7 : f32 to vector<8x128xf32>
    %c0_i32_8 = arith.constant 0 : i32
    %c4_i32 = arith.constant 4 : i32
    %24 = arith.addi %c0_i32_8, %c4_i32 : i32
    %c1_i32 = arith.constant 1 : i32
    %25 = scf.for %arg7 = %c0_i32_8 to %24 step %c1_i32 iter_args(%arg8 = %23) -> (vector<8x128xf32>)  : i32 {
      %32 = arith.index_cast %arg7 : i32 to index
      %c0_13 = arith.constant 0 : index
      %c0_14 = arith.constant 0 : index
      %33 = vector.load %arg2[%32, %c0_13, %c0_14] : memref<4x32x24xbf16, #tpu.memory_space<vmem>>, vector<1x32x24xbf16>
      %34 = vector.shape_cast %33 : vector<1x32x24xbf16> to vector<32x24xbf16>
      %cst_15 = arith.constant dense<0.000000e+00> : vector<8x24xf32>
      %35 = tpu.matmul %22, %34, %cst_15 {dimension_numbers = #tpu.dot_dimension_numbers<[1], [0], [0], [1], [0, 0, 1, 1], [], []>} : vector<8x32xbf16>, vector<32x24xbf16>, vector<8x24xf32> -> vector<8x24xf32>
      %36 = arith.index_cast %arg7 : i32 to index
      %c0_16 = arith.constant 0 : index
      %c0_17 = arith.constant 0 : index
      %37 = vector.load %arg3[%36, %c0_16, %c0_17] : memref<4x1x24xf32, #tpu.memory_space<vmem>>, vector<1x1x24xf32>
      %38 = vector.shape_cast %37 : vector<1x1x24xf32> to vector<1x24xf32>
      %39 = vector.broadcast %38 : vector<1x24xf32> to vector<8x24xf32>
      %40 = arith.addf %35, %39 : vector<8x24xf32>
      %41 = vector.extract_strided_slice %40 {offsets = [0, 0], sizes = [8, 8], strides = [1, 1]} : vector<8x24xf32> to vector<8x8xf32>
      %42 = arith.truncf %41 : vector<8x8xf32> to vector<8x8xbf16>
      %43 = vector.extract_strided_slice %40 {offsets = [0, 8], sizes = [8, 8], strides = [1, 1]} : vector<8x24xf32> to vector<8x8xf32>
      %44 = arith.truncf %43 : vector<8x8xf32> to vector<8x8xbf16>
      %45 = vector.extract_strided_slice %40 {offsets = [0, 16], sizes = [8, 8], strides = [1, 1]} : vector<8x24xf32> to vector<8x8xf32>
      %46 = arith.truncf %45 : vector<8x8xf32> to vector<8x8xbf16>
      %cst_18 = arith.constant dense<0.000000e+00> : vector<8x8xf32>
      %47 = tpu.matmul %42, %44, %cst_18 {dimension_numbers = #tpu.dot_dimension_numbers<[1], [1], [0], [0], [0, 0, 1, 0], [], []>} : vector<8x8xbf16>, vector<8x8xbf16>, vector<8x8xf32> -> vector<8x8xf32>
      %cst_19 = arith.constant dense<0xFF800000> : vector<8xf32>
      %48 = vector.multi_reduction <maximumf>, %47, %cst_19 [1] : vector<8x8xf32> to vector<8xf32>
      %49 = vector.shape_cast %48 : vector<8xf32> to vector<8x1xf32>
      %50 = vector.broadcast %49 : vector<8x1xf32> to vector<8x8xf32>
      %51 = arith.subf %47, %50 : vector<8x8xf32>
      %52 = math.exp %51 : vector<8x8xf32>
      %cst_20 = arith.constant dense<0.000000e+00> : vector<8xf32>
      %53 = vector.multi_reduction <add>, %52, %cst_20 [1] : vector<8x8xf32> to vector<8xf32>
      %54 = vector.shape_cast %53 : vector<8xf32> to vector<8x1xf32>
      %cst_21 = arith.constant 1.000000e+00 : f32
      %55 = vector.broadcast %cst_21 : f32 to vector<8x1xf32>
      %56 = arith.divf %55, %54 : vector<8x1xf32>
      %57 = arith.truncf %52 : vector<8x8xf32> to vector<8x8xbf16>
      %cst_22 = arith.constant dense<0.000000e+00> : vector<8x8xf32>
      %58 = tpu.matmul %57, %46, %cst_22 {dimension_numbers = #tpu.dot_dimension_numbers<[1], [0], [0], [1], [0, 0, 1, 1], [], []>} : vector<8x8xbf16>, vector<8x8xbf16>, vector<8x8xf32> -> vector<8x8xf32>
      %59 = vector.broadcast %56 : vector<8x1xf32> to vector<8x8xf32>
      %60 = arith.mulf %58, %59 : vector<8x8xf32>
      %61 = arith.truncf %60 : vector<8x8xf32> to vector<8x8xbf16>
      %62 = arith.index_cast %arg7 : i32 to index
      %c0_23 = arith.constant 0 : index
      %c0_24 = arith.constant 0 : index
      %63 = vector.load %arg4[%62, %c0_23, %c0_24] : memref<4x8x128xbf16, #tpu.memory_space<vmem>>, vector<1x8x128xbf16>
      %64 = vector.shape_cast %63 : vector<1x8x128xbf16> to vector<8x128xbf16>
      %cst_25 = arith.constant dense<0.000000e+00> : vector<8x128xf32>
      %65 = tpu.matmul %61, %64, %cst_25 {dimension_numbers = #tpu.dot_dimension_numbers<[1], [0], [0], [1], [0, 0, 1, 1], [], []>} : vector<8x8xbf16>, vector<8x128xbf16>, vector<8x128xf32> -> vector<8x128xf32>
      %66 = arith.addf %arg8, %65 : vector<8x128xf32>
      scf.yield %66 : vector<8x128xf32>
    }
    %c4_i32_9 = arith.constant 4 : i32
    %26 = vector.broadcast %0 : vector<1x128xf32> to vector<8x128xf32>
    %27 = arith.addf %25, %26 : vector<8x128xf32>
    %28 = arith.index_cast %c0_i32 : i32 to index
    %c0_10 = arith.constant 0 : index
    %c0_11 = arith.constant 0 : index
    %29 = vector.load %arg6[%28, %c0_10, %c0_11] : memref<1x8x128xf32, #tpu.memory_space<vmem>>, vector<1x8x128xf32>
    %30 = vector.shape_cast %29 : vector<1x8x128xf32> to vector<8x128xf32>
    %31 = vector.shape_cast %27 : vector<8x128xf32> to vector<1x8x128xf32>
    tpu.vector_store %arg6[%28, %c0_10, %c0_11], %31 {strides = array<i32>} : memref<1x8x128xf32, #tpu.memory_space<vmem>>, vector<1x8x128xf32>,
    %c1_i32_12 = arith.constant 1 : i32
    return
  }
  func.func @transform_0(%arg0: i32) -> (i32, i32, i32) {
    %c0_i32 = arith.constant 0 : i32
    %c0_i32_0 = arith.constant 0 : i32
    %c0_i32_1 = arith.constant 0 : i32
    return %arg0, %c0_i32, %c0_i32_0 : i32, i32, i32
  }
  func.func @transform_1(%arg0: i32) -> (i32, i32, i32) {
    %c0_i32 = arith.constant 0 : i32
    %c0_i32_0 = arith.constant 0 : i32
    %c0_i32_1 = arith.constant 0 : i32
    %c0_i32_2 = arith.constant 0 : i32
    return %c0_i32, %c0_i32_0, %c0_i32_1 : i32, i32, i32
  }
  func.func @transform_2(%arg0: i32) -> (i32, i32, i32) {
    %c0_i32 = arith.constant 0 : i32
    %c0_i32_0 = arith.constant 0 : i32
    %c0_i32_1 = arith.constant 0 : i32
    %c0_i32_2 = arith.constant 0 : i32
    return %c0_i32, %c0_i32_0, %c0_i32_1 : i32, i32, i32
  }
  func.func @transform_3(%arg0: i32) -> (i32, i32, i32) {
    %c0_i32 = arith.constant 0 : i32
    %c0_i32_0 = arith.constant 0 : i32
    %c0_i32_1 = arith.constant 0 : i32
    %c0_i32_2 = arith.constant 0 : i32
    return %c0_i32, %c0_i32_0, %c0_i32_1 : i32, i32, i32
  }
  func.func @transform_4(%arg0: i32) -> (i32, i32) {
    %c0_i32 = arith.constant 0 : i32
    %c0_i32_0 = arith.constant 0 : i32
    %c0_i32_1 = arith.constant 0 : i32
    return %c0_i32, %c0_i32_0 : i32, i32
  }
  func.func @transform_5(%arg0: i32) -> (i32, i32, i32) {
    %c0_i32 = arith.constant 0 : i32
    %c0_i32_0 = arith.constant 0 : i32
    %c0_i32_1 = arith.constant 0 : i32
    return %arg0, %c0_i32, %c0_i32_0 : i32, i32, i32
  }
}

module attributes {stable_mosaic.version = 11 : i64} {
  func.func @_mhsa_kernel(%arg0: i32, %arg1: memref<1x8x32xf32, #tpu.memory_space<vmem>>, %arg2: memref<4x32x24xbf16, #tpu.memory_space<vmem>>, %arg3: memref<4x1x24xf32, #tpu.memory_space<vmem>>, %arg4: memref<4x8x128xbf16, #tpu.memory_space<vmem>>, %arg5: memref<1x128xf32, #tpu.memory_space<vmem>>, %arg6: memref<1x8x128xf32, #tpu.memory_space<vmem>>) attributes {dimension_semantics = [#tpu.dimension_semantics<parallel>], iteration_bounds = array<i64: 2>, scalar_prefetch = 0 : i64, scratch_operands = 0 : i64, tpu.core_type = #tpu.core_type<tc>, window_params = [{transform_indices = @transform_0, window_bounds = array<i64: 1, 8, 32>}, {pipeline_mode = #tpu.pipeline_mode<synchronous>, transform_indices = @transform_1, window_bounds = array<i64: 4, 32, 24>}, {pipeline_mode = #tpu.pipeline_mode<synchronous>, transform_indices = @transform_2, window_bounds = array<i64: 4, 1, 24>}, {pipeline_mode = #tpu.pipeline_mode<synchronous>, transform_indices = @transform_3, window_bounds = array<i64: 4, 8, 128>}, {pipeline_mode = #tpu.pipeline_mode<synchronous>, transform_indices = @transform_4, window_bounds = array<i64: 1, 128>}, {transform_indices = @transform_5, window_bounds = array<i64: 1, 8, 128>}]} {
    %c0 = arith.constant 0 : index
    %c0_0 = arith.constant 0 : index
    %0 = vector.load %arg5[%c0, %c0_0] : memref<1x128xf32, #tpu.memory_space<vmem>>, vector<1x128xf32>
    %c0_i32 = arith.constant 0 : i32
    %1 = arith.index_cast %c0_i32 : i32 to index
    %c0_1 = arith.constant 0 : index
    %c0_2 = arith.constant 0 : index
    %2 = vector.load %arg1[%1, %c0_1, %c0_2] : memref<1x8x32xf32, #tpu.memory_space<vmem>>, vector<1x8x32xf32>
    %3 = vector.shape_cast %2 : vector<1x8x32xf32> to vector<8x32xf32>
    %cst = arith.constant dense<0.000000e+00> : vector<8xf32>
    %4 = vector.multi_reduction <add>, %3, %cst [1] : vector<8x32xf32> to vector<8xf32>
    %5 = vector.shape_cast %4 : vector<8xf32> to vector<8x1xf32>
    %cst_3 = arith.constant 3.200000e+01 : f32
    %6 = vector.broadcast %cst_3 : f32 to vector<8x1xf32>
    %7 = arith.divf %5, %6 : vector<8x1xf32>
    %8 = arith.mulf %3, %3 : vector<8x32xf32>
    %cst_4 = arith.constant dense<0.000000e+00> : vector<8xf32>
    %9 = vector.multi_reduction <add>, %8, %cst_4 [1] : vector<8x32xf32> to vector<8xf32>
    %10 = vector.shape_cast %9 : vector<8xf32> to vector<8x1xf32>
    %cst_5 = arith.constant 3.200000e+01 : f32
    %11 = vector.broadcast %cst_5 : f32 to vector<8x1xf32>
    %12 = arith.divf %10, %11 : vector<8x1xf32>
    %13 = arith.mulf %7, %7 : vector<8x1xf32>
    %14 = arith.subf %12, %13 : vector<8x1xf32>
    %15 = vector.broadcast %7 : vector<8x1xf32> to vector<8x32xf32>
    %16 = arith.subf %3, %15 : vector<8x32xf32>
    %cst_6 = arith.constant 9.99999974E-6 : f32
    %17 = vector.broadcast %cst_6 : f32 to vector<8x1xf32>
    %18 = arith.addf %14, %17 : vector<8x1xf32>
    %19 = math.rsqrt %18 : vector<8x1xf32>
    %20 = vector.broadcast %19 : vector<8x1xf32> to vector<8x32xf32>
    %21 = arith.mulf %16, %20 : vector<8x32xf32>
    %22 = arith.truncf %21 : vector<8x32xf32> to vector<8x32xbf16>
    %cst_7 = arith.constant 0.000000e+00 : f32
    %23 = vector.broadcast %cst_7 : f32 to vector<8x128xf32>
    %c0_i32_8 = arith.constant 0 : i32
    %c4_i32 = arith.constant 4 : i32
    %24 = arith.addi %c0_i32_8, %c4_i32 : i32
    %c1_i32 = arith.constant 1 : i32
    %25 = scf.for %arg7 = %c0_i32_8 to %24 step %c1_i32 iter_args(%arg8 = %23) -> (vector<8x128xf32>)  : i32 {
      %32 = arith.index_cast %arg7 : i32 to index
      %c0_13 = arith.constant 0 : index
      %c0_14 = arith.constant 0 : index
      %33 = vector.load %arg2[%32, %c0_13, %c0_14] : memref<4x32x24xbf16, #tpu.memory_space<vmem>>, vector<1x32x24xbf16>
      %34 = vector.shape_cast %33 : vector<1x32x24xbf16> to vector<32x24xbf16>
      %cst_15 = arith.constant dense<0.000000e+00> : vector<8x24xf32>
      %35 = tpu.matmul %22, %34, %cst_15 {dimension_numbers = #tpu.dot_dimension_numbers<[1], [0], [0], [1], [0, 0, 1, 1], [], []>} : vector<8x32xbf16>, vector<32x24xbf16>, vector<8x24xf32> -> vector<8x24xf32>
      %36 = arith.index_cast %arg7 : i32 to index
      %c0_16 = arith.constant 0 : index
      %c0_17 = arith.constant 0 : index
      %37 = vector.load %arg3[%36, %c0_16, %c0_17] : memref<4x1x24xf32, #tpu.memory_space<vmem>>, vector<1x1x24xf32>
      %38 = vector.shape_cast %37 : vector<1x1x24xf32> to vector<1x24xf32>
      %39 = vector.broadcast %38 : vector<1x24xf32> to vector<8x24xf32>
      %40 = arith.addf %35, %39 : vector<8x24xf32>
      %41 = vector.extract_strided_slice %40 {offsets = [0, 0], sizes = [8, 8], strides = [1, 1]} : vector<8x24xf32> to vector<8x8xf32>
      %42 = arith.truncf %41 : vector<8x8xf32> to vector<8x8xbf16>
      %43 = vector.extract_strided_slice %40 {offsets = [0, 8], sizes = [8, 8], strides = [1, 1]} : vector<8x24xf32> to vector<8x8xf32>
      %44 = arith.truncf %43 : vector<8x8xf32> to vector<8x8xbf16>
      %45 = vector.extract_strided_slice %40 {offsets = [0, 16], sizes = [8, 8], strides = [1, 1]} : vector<8x24xf32> to vector<8x8xf32>
      %46 = arith.truncf %45 : vector<8x8xf32> to vector<8x8xbf16>
      %cst_18 = arith.constant dense<0.000000e+00> : vector<8x8xf32>
      %47 = tpu.matmul %42, %44, %cst_18 {dimension_numbers = #tpu.dot_dimension_numbers<[1], [1], [0], [0], [0, 0, 1, 0], [], []>} : vector<8x8xbf16>, vector<8x8xbf16>, vector<8x8xf32> -> vector<8x8xf32>
      %cst_19 = arith.constant dense<0xFF800000> : vector<8xf32>
      %48 = vector.multi_reduction <maximumf>, %47, %cst_19 [1] : vector<8x8xf32> to vector<8xf32>
      %49 = vector.shape_cast %48 : vector<8xf32> to vector<8x1xf32>
      %50 = vector.broadcast %49 : vector<8x1xf32> to vector<8x8xf32>
      %51 = arith.subf %47, %50 : vector<8x8xf32>
      %52 = math.exp %51 : vector<8x8xf32>
      %cst_20 = arith.constant dense<0.000000e+00> : vector<8xf32>
      %53 = vector.multi_reduction <add>, %52, %cst_20 [1] : vector<8x8xf32> to vector<8xf32>
      %54 = vector.shape_cast %53 : vector<8xf32> to vector<8x1xf32>
      %cst_21 = arith.constant 1.000000e+00 : f32
      %55 = vector.broadcast %cst_21 : f32 to vector<8x1xf32>
      %56 = arith.divf %55, %54 : vector<8x1xf32>
      %57 = arith.truncf %52 : vector<8x8xf32> to vector<8x8xbf16>
      %cst_22 = arith.constant dense<0.000000e+00> : vector<8x8xf32>
      %58 = tpu.matmul %57, %46, %cst_22 {dimension_numbers = #tpu.dot_dimension_numbers<[1], [0], [0], [1], [0, 0, 1, 1], [], []>} : vector<8x8xbf16>, vector<8x8xbf16>, vector<8x8xf32> -> vector<8x8xf32>
      %59 = vector.broadcast %56 : vector<8x1xf32> to vector<8x8xf32>
      %60 = arith.mulf %58, %59 : vector<8x8xf32>
      %61 = arith.truncf %60 : vector<8x8xf32> to vector<8x8xbf16>
      %62 = arith.index_cast %arg7 : i32 to index
      %c0_23 = arith.constant 0 : index
      %c0_24 = arith.constant 0 : index
      %63 = vector.load %arg4[%62, %c0_23, %c0_24] : memref<4x8x128xbf16, #tpu.memory_space<vmem>>, vector<1x8x128xbf16>
      %64 = vector.shape_cast %63 : vector<1x8x128xbf16> to vector<8x128xbf16>
      %cst_25 = arith.constant dense<0.000000e+00> : vector<8x128xf32>
      %65 = tpu.matmul %61, %64, %cst_25 {dimension_numbers = #tpu.dot_dimension_numbers<[1], [0], [0], [1], [0, 0, 1, 1], [], []>} : vector<8x8xbf16>, vector<8x128xbf16>, vector<8x128xf32> -> vector<8x128xf32>
      %66 = arith.addf %arg8, %65 : vector<8x128xf32>
      scf.yield %66 : vector<8x128xf32>
    }
    %c4_i32_9 = arith.constant 4 : i32
    %26 = vector.broadcast %0 : vector<1x128xf32> to vector<8x128xf32>
    %27 = arith.addf %25, %26 : vector<8x128xf32>
    %28 = arith.index_cast %c0_i32 : i32 to index
    %c0_10 = arith.constant 0 : index
    %c0_11 = arith.constant 0 : index
    %29 = vector.load %arg6[%28, %c0_10, %c0_11] : memref<1x8x128xf32, #tpu.memory_space<vmem>>, vector<1x8x128xf32>
    %30 = vector.shape_cast %29 : vector<1x8x128xf32> to vector<8x128xf32>
    %31 = vector.shape_cast %27 : vector<8x128xf32> to vector<1x8x128xf32>
    tpu.vector_store %arg6[%28, %c0_10, %c0_11], %31 {strides = array<i32>} : memref<1x8x128xf32, #tpu.memory_space<vmem>>, vector<1x8x128xf32>,
    %c1_i32_12 = arith.constant 1 : i32
    return
  }
  func.func @transform_0(%arg0: i32) -> (i32, i32, i32) {
    %c0_i32 = arith.constant 0 : i32
    %c0_i32_0 = arith.constant 0 : i32
    %c0_i32_1 = arith.constant 0 : i32
    return %arg0, %c0_i32, %c0_i32_0 : i32, i32, i32
  }
  func.func @transform_1(%arg0: i32) -> (i32, i32, i32) {
    %c0_i32 = arith.constant 0 : i32
    %c0_i32_0 = arith.constant 0 : i32
    %c0_i32_1 = arith.constant 0 : i32
    %c0_i32_2 = arith.constant 0 : i32
    return %c0_i32, %c0_i32_0, %c0_i32_1 : i32, i32, i32
  }
  func.func @transform_2(%arg0: i32) -> (i32, i32, i32) {
    %c0_i32 = arith.constant 0 : i32
    %c0_i32_0 = arith.constant 0 : i32
    %c0_i32_1 = arith.constant 0 : i32
    %c0_i32_2 = arith.constant 0 : i32
    return %c0_i32, %c0_i32_0, %c0_i32_1 : i32, i32, i32
  }
  func.func @transform_3(%arg0: i32) -> (i32, i32, i32) {
    %c0_i32 = arith.constant 0 : i32
    %c0_i32_0 = arith.constant 0 : i32
    %c0_i32_1 = arith.constant 0 : i32
    %c0_i32_2 = arith.constant 0 : i32
    return %c0_i32, %c0_i32_0, %c0_i32_1 : i32, i32, i32
  }
  func.func @transform_4(%arg0: i32) -> (i32, i32) {
    %c0_i32 = arith.constant 0 : i32
    %c0_i32_0 = arith.constant 0 : i32
    %c0_i32_1 = arith.constant 0 : i32
    return %c0_i32, %c0_i32_0 : i32, i32
  }
  func.func @transform_5(%arg0: i32) -> (i32, i32, i32) {
    %c0_i32 = arith.constant 0 : i32
    %c0_i32_0 = arith.constant 0 : i32
    %c0_i32_1 = arith.constant 0 : i32
    return %arg0, %c0_i32, %c0_i32_0 : i32, i32, i32
  }
}

</mosaic_0001>

<bundles_post_ra>
// kernel: tpu_custom_call.1
= control target key start
LH: loop header
LB: loop body
LE: loop exit
PB: predicated region body
PF: predicated region fallthrough
CT: control target
= control target key end

     0   :  { %10 = vsyncpa [#allocation3], 0  ;;  %s971_s0 = inlined_call_operand.vmem [shape: f32[2,8,32], index: 0, kind: input, shape index: {}]   ;;  %s972_s1 = inlined_call_operand.vmem [shape: bf16[4,32,24], index: 1, kind: input, shape index: {}]   ;;  %s973_s2 = inlined_call_operand.vmem [shape: f32[4,1,24], index: 2, kind: input, shape index: {}]   ;;  %s974_s3 = inlined_call_operand.vmem [shape: bf16[4,8,128], index: 3, kind: input, shape index: {}]   ;;  %s975_s4 = inlined_call_operand.vmem [shape: f32[1,128], index: 4, kind: input, shape index: {}]   ;;  %s976_s5 = inlined_call_operand.hbm [shape: f32[2,8,128], index: 5, kind: output, shape index: {}]  }
   0x1   :  { %12 = vsyncpa [#allocation3 + $0x1], 0  ;;  %s813_s18 = smov 0   ;;  %s815_s19 = smov 0  }
   0x2   :  { %s817_s20 = smov 0   ;;  %s819_s21 = smov 0  }
   0x3 LB: > { %s834_s22 = sadd.s32 4294967295, %s768_s21   ;;  %s576_s23 = sadd.s32 4294967294, %s768_s21   ;;  %s768_s21 = sphi %s819_s21, %s983_s21   ;;  %s764_s20 = sphi %s817_s20, %s982_s20   ;;  %s760_s19 = sphi %s815_s19, %s981_s19   ;;  %s756_s18 = sphi %s813_s18, %s980_s18  }
   0x4   : > { %s838_s24 = sadd.s32 1, %s768_s21   ;;  %s135_s25 = sadd.s32 1, %s764_s20 }
   0x5   : > { %s132_s26 = ssub.s32 %s768_s21, %s838_s24  ;;  %p145_p0 = scmp.ne.s32.totalorder %s764_s20, %s760_s19 }
   0x6   : > { %p133_p1 = scmp.eq.s32.totalorder %s132_s26, 0  ;;  %p146_p2 = scmp.eq.s32.totalorder %s834_s22, 1 }
   0x7   : > { %p151_p3 = scmp.ne.s32.totalorder %s760_s19, %s756_s18  ;;  %p152_p4 = scmp.eq.s32.totalorder %s576_s23, 1 }
   0x8   : > { %s849_s27 = scalar_select %p133_p1, %s764_s20, %s135_s25  }
   0x9   : > { %p851_p5 = por %p146_p2, %p145_p0  ;;  %p855_p6 = por %p152_p4, %p151_p3 }
   0xa   : > { %p579_p7 = scmp.ge.s32.totalorder %s768_s21, 1  ;;  %p189_p8 = scmp.lt.s32.totalorder %s768_s21, 3 }
   0xc   : > { %p190_p9 = pnand %p579_p7, %p189_p8 }
   0xd   : > { %p216_p10 = scmp.lt.s32.totalorder (!%p190_p9), %s834_s22, 1  ;;  %s213_s10 = sand.u32 (!%p190_p9), 1, %s760_s19  }
   0xe   : > { %193 = sbr.rel (%p190_p9) target bundleno = 1280 (0x500), region = 40  ;;  %s871_s11 = sshll.u32 (!%p190_p9), %s213_s10, 3 }
   0xf   : > { %s215_s14 = scalar_lea.vmem (!%p190_p9), [#allocation2], %s871_s11  ;;  %s885_s15 = smov (!%p190_p9), 0  }
  0x13   : > { %s217_s30 = scalar_select %p216_p10, %s834_s22, 1  ;;  %vm223_vm0 = vcmask 261120   ;;  %v876_v4 = vld [vmem:[%s975_s4] ss:$0 sm:$0xff]  ;;  %v883_v16 = vmov 0.0  }
  0x15   : > { %s581_s6 = sshll.u32 %s217_s30, 3 }
  0x16   : > { %s219_s9 = scalar_lea.vmem %s971_s0, %s581_s6 }
  0x17   : > { %v222_v0 = vld [vmem:[%s219_s9] sm:$0xff] }
  0x18   : > { %v224_v1 = vsel %vm223_vm0, %v222_v0, 0.0  ;;  %v229_v2 = vmul.f32 %v222_v0, %v222_v0 }
  0x19   : > { %225 = vadd.xlane.f32.xlu0 %v224_v1 }
  0x1a   : > { %v230_v3 = vsel %vm223_vm0, %v229_v2, 0.0 }
  0x1d   : > { %231 = vadd.xlane.f32.xlu0 %v230_v3 }
  0xa2   : > { %v226_v5 = vpop.xlane.xlu0 %225 }
  0xa3   : > { %v228_v6 = vmul.f32 0.03125, %v226_v5 }
  0xa5   : > { %v234_v8 = vmul.f32 %v228_v6, %v228_v6  ;;  %v236_v12 = vsub.f32 %v222_v0, %v228_v6 }
  0xa6   : > { %v232_v7 = vpop.xlane.xlu0 %231 }
  0xa7   : > { %v233_v9 = vmul.f32 0.03125, %v232_v7 }
  0xa9   : > { %v235_v10 = vsub.f32 %v233_v9, %v234_v8 }
  0xab   : > { %v237_v11 = vadd.f32 1e-05, %v235_v10 }
  0xad   : > { %692 = vrsqrt.f32 %v237_v11 }
  0xba   : > { %v693_v13 = vpop.eup %692 }
  0xbb   : > { %v878_v14 = vmul.f32 %v693_v13, %v236_v12 }
  0xbd   : > { %v240_v15 = vpack.c.bf16 %v878_v14, %v878_v14 }
  0xbe LB: >> { %v778_v17 = vmov 0.0   ;;  %vm779_vm1 = vmmov 0   ;;  %s597_s16 = sshll.u32 %s776_s15, 4  ;;  %s255_s6 = scalar_lea.vmem %s973_s2, %s776_s15  ;;  %vm386_vm2 = vcmask 1043456   ;;  %vm322_vm3 = vcmask 64512   ;;  %s776_s15 = sphi %s885_s15, %s246_s15   ;;  %v772_v16 = vphi %v883_v16, %v979_v16  }
  0xbf   : >> { %607 = vmatprep.subr.bf16.mxu0 %v778_v17  ;;  %611 = vmatprep.mubr.msk.bf16.mxu0 %vm779_vm1, %v778_v17  ;;  %s250_s25 = scalar_lea.vmem %s972_s1, %s597_s16  ;;  %v584_v20 = vld [vmem:[%s255_s6] ss:$0 sm:$0xff]  ;;  %s780_s7 = smov 112  }
  0xc0   : >> { %615 = vmatprep.subr.bf16.mxu1 %v778_v17  ;;  %617 = vmatprep.mubr.msk.bf16.mxu1 %vm779_vm1, %v778_v17  ;;  %v694_v18 = vld [vmem:[%s250_s25 + $0x8] sm:$0xff]   ;;  %v695_v19 = vld [vmem:[%s250_s25] sm:$0xff]   ;;  %s781_s8 = smov 120   ;;  %s590_s9 = sshll.u32 %s776_s15, 2 }
  0xc1   : >> { %608 = vmatpush3.bf16.msra.mxu0 %v694_v18  ;;  %s433_s16 = scalar_lea.vmem %s974_s3, %s590_s9  ;;  %s246_s15 = sadd.s32 1, %s776_s15  }
  0xc2   : >> { %609 = vmatprep.subr.bf16.mxu0 %v778_v17  ;;  %v434_v31 = vld [vmem:[%s433_s16] sm:$0xf]  ;;  %p243_p11 = scmp.ge.s32.totalorder %s246_s15, 4  }
  0xc3   : >> { %v439_v32 = vsel %vm386_vm2, %v434_v31, 0  ;;  %s594_s17 = sshll.u32 (%p243_p11), %s834_s22, 7  ;;  %s504_s30 = sshll.u32 (%p243_p11), %s215_s14, 4  ;;  %s505_s30 = int_to_ptr.vmem [resolvable:$true] %s504_s30 }
  0xc4   : > { %s930_s26 = scalar_lea.hbm (%p243_p11), %s976_s5, %s594_s17  ;;  %s491_s15 = scalar_lea.sflag (%p243_p11), [#allocation3], %s213_s10 }
  0xc5   : >> { %610 = vmatpush3.bf16.msra.mxu0 %v695_v19  ;;  %s700_s6 = scalar_lea.vmem (%p243_p11), %s505_s30, 128 }
  0xc6   : >> { %621 = vmatprep.subr.bf16.mxu0 %v778_v17  ;;  %p701_p12 = scmp.ne.s32.totalorder (%p243_p11), %s505_s30, %s700_s6 }
  0xc8   : >> { %612 = vmatmul.mubr.msk.bf16.vlgmr.msra.gmra.mxu0 %vm223_vm0, %v240_v15  ;;  %p702_p13 = pnand (%p243_p11), %p701_p12, %p851_p5 }
  0xc9   : >> { %623 = vmatprep.mubr.msk.bf16.mxu0 %vm779_vm1, %v778_v17 }
  0xca   : > { %p703_p0 = pneg (%p243_p11), %p702_p13 }
 0x188   : >> { %v312_v21 = vpop.f32.mrf.mxu0 }
 0x189   : >> { %v313_v22 = vadd.f32 %v584_v20, %v312_v21 }
 0x18a   : >> { %v613_v23 = vpop.f32.mrf.mxu0 }
 0x18b   : >> { %v318_v24 = vpack.c.bf16 %v313_v22, %v313_v22 }
 0x18c   : >> { %v315_v25 = vpop.f32.mrf.mxu0 }
 0x18d   : >> { %381 = vrot.lane.b32.xlu1 %v318_v24, %s780_s7  ;;  %320 = vrot.lane.b32.xlu0 %v318_v24, %s781_s8  ;;  %s782_s7 = smov (%p243_p11), [#allocation2]  }
 0x18e   : >> { %v614_v26 = vpop.f32.mrf.mxu0  ;;  %s704_s8 = sshll.u32 (%p243_p11), %s782_s7, 4  ;;  %s705_s8 = int_to_ptr.vmem [resolvable:$false] %s704_s8 }
 0x18f   : > { %s706_s22 = scalar_lea.vmem (%p243_p11), %s705_s8, 256  ;;  %p707_p1 = scmp.lt.s32.totalorder (%p243_p11), %s505_s30, %s705_s8 }
 0x190   : > { %p708_p2 = scmp.lt.s32.totalorder (%p243_p11), %s706_s22, %s700_s6 }
 0x192   : > { %p709_p3 = por (%p243_p11), %p708_p2, %p707_p1 }
 0x194   : > { %p710_p4 = pnand (%p243_p11), %p709_p3, %p703_p0 }
 0x1ff   : >> { %v382_v27 = vpop.permute.xlu1 %381  ;;  %v321_v28 = vpop.permute.xlu0 %320 }
 0x200   : >> { %v388_v29 = vsel %vm386_vm2, %v382_v27, 0  ;;  %v327_v30 = vsel %vm322_vm3, %v321_v28, 0 }
 0x201   : >> { %616 = vmatpush3.bf16.xpose.msra.mxu1 %v327_v30  ;;  %622 = vmatpush3.bf16.msra.mxu0 %v388_v29 }
 0x202   : >> { %627 = vmatprep.subr.bf16.mxu1 %v778_v17 }
 0x208   : >> { %618 = vmatmul.mubr.msk.bf16.vlgmr.msra.gmra.mxu1 %vm322_vm3, %v318_v24 }
 0x209   : >> { %628 = vmatpush3.bf16.msra.mxu1 %v439_v32  ;;  %629 = vmatprep.mubr.msk.bf16.mxu1 %vm779_vm1, %v778_v17 }
 0x2c8   : >> { %v363_v33 = vpop.f32.mrf.mxu1 }
 0x2c9   : >> { %v369_v34 = vsel %vm322_vm3, %v363_v33, -inf }
 0x2ca   : >> { %370 = vmax.xlane.f32.xlu0 %v369_v34  ;;  %v619_v35 = vpop.f32.mrf.mxu1 }
 0x2cc   : >> { %v366_v36 = vpop.f32.mrf.mxu1 }
 0x2ce   : >> { %v620_v37 = vpop.f32.mrf.mxu1 }
 0x353   : >> { %v371_v38 = vpop.xlane.xlu0 %370 }
 0x354   : >> { %v372_v39 = vsub.f32 %v363_v33, %v371_v38 }
 0x356   : >> { %v373_v40 = vmul.f32 1.442695, %v372_v39 }
 0x358   : >> { %696 = vpow2.f32 %v373_v40 }
 0x365   : >> { %v697_v41 = vpop.eup %696 }
 0x366   : >> { %v375_v42 = vsel %vm322_vm3, %v697_v41, 0.0  ;;  %v380_v43 = vpack.c.bf16 %v697_v41, %v697_v41 }
 0x367   : >> { %376 = vadd.xlane.f32.xlu1 %v375_v42 }
 0x368   : >> { %624 = vmatmul.mubr.msk.bf16.vlgmr.msra.gmra.mxu0 %vm322_vm3, %v380_v43 }
 0x3f0   : >> { %v377_v44 = vpop.xlane.xlu1 %376 }
 0x3f1   : >> { %698 = vrcp.f32 %v377_v44 }
 0x3fe   : >> { %v699_v45 = vpop.eup %698 }
 0x428   : >> { %v424_v46 = vpop.f32.mrf.mxu0 }
 0x429   : >> { %v430_v47 = vmul.f32 %v699_v45, %v424_v46 }
 0x42a   : >> { %v625_v48 = vpop.f32.mrf.mxu0 }
 0x42b   : >> { %v431_v49 = vpack.c.bf16 %v430_v47, %v430_v47 }
 0x42c   : >> { %v427_v50 = vpop.f32.mrf.mxu0 }
 0x42d   : >> { %630 = vmatmul.mubr.msk.bf16.vlgmr.msra.gmra.mxu1 %vm322_vm3, %v431_v49 }
 0x42e   : >> { %v626_v51 = vpop.f32.mrf.mxu0 }
 0x4ed   : >> { %v475_v52 = vpop.f32.mrf.mxu1 }
 0x4ee   : >> { %v481_v53 = vadd.f32 %v772_v16, %v475_v52  }
 0x4ef   : >> { %v631_v54 = vpop.f32.mrf.mxu1  ;;  %245 = sbr.rel (!%p243_p11) target bundleno = 190 (0xbe), region = 85 }
 0x4f0   : >> { %v979_v16 = vmov %v481_v53  ;;  %v488_v57 = vadd.f32 (%p243_p11), %v876_v4, %v481_v53 }
 0x4f1   : >> { %v478_v55 = vpop.f32.mrf.mxu1 }
 0x4f2   : > { %489 = vst [vmem:[%s215_s14] sm:$0xff] (%p243_p11), %v488_v57 }
 0x4f3   : >> { %v632_v56 = vpop.f32.mrf.mxu1 }
 0x4f4   : > { %713 = shalt.err (!%p710_p4)
}
 0x4f5   : > { %s714_s11 = scalar_lea.hbm %s930_s26, 128  ;;  %s718_s9 = scalar_lea.hbm %s976_s5, 256 }
 0x4f6   : > { %p715_p7 = scmp.ne.s32.totalorder %s930_s26, %s714_s11  ;;  %p719_p10 = scmp.lt.s32.totalorder %s930_s26, %s976_s5 }
 0x4f7   : > { %p720_p11 = scmp.lt.s32.totalorder %s718_s9, %s714_s11 }
 0x4f8   : > { %p716_p8 = pnand %p715_p7, %p851_p5 }
 0x4f9   : > { %p721_p12 = por %p720_p11, %p719_p10 }
 0x4fa   : > { %p717_p9 = pneg %p716_p8 }
 0x4fc   : > { %p722_p13 = pnand %p721_p12, %p717_p9 }
 0x4fe   : > { %725 = shalt.err (!%p722_p13)
}
 0x4ff   : > { %633 = dma.vmem_to_hbm [thread:$0]  (%p851_p5), %s505_s30, 128, %s930_s26, %s491_s15  }
 0x500 PF: > { %p639_p0 = scmp.ge.s32.totalorder %s768_s21, 2  ;;  %s516_s16 = sand.u32 1, %s756_s18  }
 0x501   : > { %s517_s17 = scalar_lea.sflag [#allocation3], %s516_s16 }
 0x502   : > { %p636_p1 = pnand %p639_p0, %p855_p6 }
 0x504   : > { %p637_p2 = pneg %p636_p1 }
 0x506   : > { %751 = dma.done.wait (%p637_p2), %s517_s17, 128  }
 0x507   : > { %753 = vsyncadd (%p637_p2), %s517_s17, 4294967168  ;;  %p15_p3 = scmp.ge.s32.totalorder %s838_s24, 4   ;;  %s980_s18 = smov %s760_s19 }
 0x508   : > { %s981_s19 = smov %s764_s20  ;;  %s982_s20 = smov %s849_s27 }
 0x509   : > { %s983_s21 = smov %s838_s24  ;;  %17 = sbr.rel (!%p15_p3) target bundleno = 3 (0x3), region = 96 }
 0x50e   :  { %522 = vsyncpa [#allocation3], 1 }
 0x50f   :  { %524 = vsyncpa [#allocation3 + $0x1], 1 }

// kernel: tpu_custom_call.1
= control target key start
LH: loop header
LB: loop body
LE: loop exit
PB: predicated region body
PF: predicated region fallthrough
CT: control target
= control target key end

     0   :  { %10 = vsyncpa [#allocation3], 0  ;;  %s971_s0 = inlined_call_operand.vmem [shape: f32[2,8,32], index: 0, kind: input, shape index: {}]   ;;  %s972_s1 = inlined_call_operand.vmem [shape: bf16[4,32,24], index: 1, kind: input, shape index: {}]   ;;  %s973_s2 = inlined_call_operand.vmem [shape: f32[4,1,24], index: 2, kind: input, shape index: {}]   ;;  %s974_s3 = inlined_call_operand.vmem [shape: bf16[4,8,128], index: 3, kind: input, shape index: {}]   ;;  %s975_s4 = inlined_call_operand.vmem [shape: f32[1,128], index: 4, kind: input, shape index: {}]   ;;  %s976_s5 = inlined_call_operand.hbm [shape: f32[2,8,128], index: 5, kind: output, shape index: {}]  }
   0x1   :  { %12 = vsyncpa [#allocation3 + $0x1], 0  ;;  %s813_s18 = smov 0   ;;  %s815_s19 = smov 0  }
   0x2   :  { %s817_s20 = smov 0   ;;  %s819_s21 = smov 0  }
   0x3 LB: > { %s834_s22 = sadd.s32 4294967295, %s768_s21   ;;  %s576_s23 = sadd.s32 4294967294, %s768_s21   ;;  %s768_s21 = sphi %s819_s21, %s983_s21   ;;  %s764_s20 = sphi %s817_s20, %s982_s20   ;;  %s760_s19 = sphi %s815_s19, %s981_s19   ;;  %s756_s18 = sphi %s813_s18, %s980_s18  }
   0x4   : > { %s838_s24 = sadd.s32 1, %s768_s21   ;;  %s135_s25 = sadd.s32 1, %s764_s20 }
   0x5   : > { %s132_s26 = ssub.s32 %s768_s21, %s838_s24  ;;  %p145_p0 = scmp.ne.s32.totalorder %s764_s20, %s760_s19 }
   0x6   : > { %p133_p1 = scmp.eq.s32.totalorder %s132_s26, 0  ;;  %p146_p2 = scmp.eq.s32.totalorder %s834_s22, 1 }
   0x7   : > { %p151_p3 = scmp.ne.s32.totalorder %s760_s19, %s756_s18  ;;  %p152_p4 = scmp.eq.s32.totalorder %s576_s23, 1 }
   0x8   : > { %s849_s27 = scalar_select %p133_p1, %s764_s20, %s135_s25  }
   0x9   : > { %p851_p5 = por %p146_p2, %p145_p0  ;;  %p855_p6 = por %p152_p4, %p151_p3 }
   0xa   : > { %p579_p7 = scmp.ge.s32.totalorder %s768_s21, 1  ;;  %p189_p8 = scmp.lt.s32.totalorder %s768_s21, 3 }
   0xc   : > { %p190_p9 = pnand %p579_p7, %p189_p8 }
   0xd   : > { %p216_p10 = scmp.lt.s32.totalorder (!%p190_p9), %s834_s22, 1  ;;  %s213_s10 = sand.u32 (!%p190_p9), 1, %s760_s19  }
   0xe   : > { %193 = sbr.rel (%p190_p9) target bundleno = 1280 (0x500), region = 40  ;;  %s871_s11 = sshll.u32 (!%p190_p9), %s213_s10, 3 }
   0xf   : > { %s215_s14 = scalar_lea.vmem (!%p190_p9), [#allocation2], %s871_s11  ;;  %s885_s15 = smov (!%p190_p9), 0  }
  0x13   : > { %s217_s30 = scalar_select %p216_p10, %s834_s22, 1  ;;  %vm223_vm0 = vcmask 261120   ;;  %v876_v4 = vld [vmem:[%s975_s4] ss:$0 sm:$0xff]  ;;  %v883_v16 = vmov 0.0  }
  0x15   : > { %s581_s6 = sshll.u32 %s217_s30, 3 }
  0x16   : > { %s219_s9 = scalar_lea.vmem %s971_s0, %s581_s6 }
  0x17   : > { %v222_v0 = vld [vmem:[%s219_s9] sm:$0xff] }
  0x18   : > { %v224_v1 = vsel %vm223_vm0, %v222_v0, 0.0  ;;  %v229_v2 = vmul.f32 %v222_v0, %v222_v0 }
  0x19   : > { %225 = vadd.xlane.f32.xlu0 %v224_v1 }
  0x1a   : > { %v230_v3 = vsel %vm223_vm0, %v229_v2, 0.0 }
  0x1d   : > { %231 = vadd.xlane.f32.xlu0 %v230_v3 }
  0xa2   : > { %v226_v5 = vpop.xlane.xlu0 %225 }
  0xa3   : > { %v228_v6 = vmul.f32 0.03125, %v226_v5 }
  0xa5   : > { %v234_v8 = vmul.f32 %v228_v6, %v228_v6  ;;  %v236_v12 = vsub.f32 %v222_v0, %v228_v6 }
  0xa6   : > { %v232_v7 = vpop.xlane.xlu0 %231 }
  0xa7   : > { %v233_v9 = vmul.f32 0.03125, %v232_v7 }
  0xa9   : > { %v235_v10 = vsub.f32 %v233_v9, %v234_v8 }
  0xab   : > { %v237_v11 = vadd.f32 1e-05, %v235_v10 }
  0xad   : > { %692 = vrsqrt.f32 %v237_v11 }
  0xba   : > { %v693_v13 = vpop.eup %692 }
  0xbb   : > { %v878_v14 = vmul.f32 %v693_v13, %v236_v12 }
  0xbd   : > { %v240_v15 = vpack.c.bf16 %v878_v14, %v878_v14 }
  0xbe LB: >> { %v778_v17 = vmov 0.0   ;;  %vm779_vm1 = vmmov 0   ;;  %s597_s16 = sshll.u32 %s776_s15, 4  ;;  %s255_s6 = scalar_lea.vmem %s973_s2, %s776_s15  ;;  %vm386_vm2 = vcmask 1043456   ;;  %vm322_vm3 = vcmask 64512   ;;  %s776_s15 = sphi %s885_s15, %s246_s15   ;;  %v772_v16 = vphi %v883_v16, %v979_v16  }
  0xbf   : >> { %607 = vmatprep.subr.bf16.mxu0 %v778_v17  ;;  %611 = vmatprep.mubr.msk.bf16.mxu0 %vm779_vm1, %v778_v17  ;;  %s250_s25 = scalar_lea.vmem %s972_s1, %s597_s16  ;;  %v584_v20 = vld [vmem:[%s255_s6] ss:$0 sm:$0xff]  ;;  %s780_s7 = smov 112  }
  0xc0   : >> { %615 = vmatprep.subr.bf16.mxu1 %v778_v17  ;;  %617 = vmatprep.mubr.msk.bf16.mxu1 %vm779_vm1, %v778_v17  ;;  %v694_v18 = vld [vmem:[%s250_s25 + $0x8] sm:$0xff]   ;;  %v695_v19 = vld [vmem:[%s250_s25] sm:$0xff]   ;;  %s781_s8 = smov 120   ;;  %s590_s9 = sshll.u32 %s776_s15, 2 }
  0xc1   : >> { %608 = vmatpush3.bf16.msra.mxu0 %v694_v18  ;;  %s433_s16 = scalar_lea.vmem %s974_s3, %s590_s9  ;;  %s246_s15 = sadd.s32 1, %s776_s15  }
  0xc2   : >> { %609 = vmatprep.subr.bf16.mxu0 %v778_v17  ;;  %v434_v31 = vld [vmem:[%s433_s16] sm:$0xf]  ;;  %p243_p11 = scmp.ge.s32.totalorder %s246_s15, 4  }
  0xc3   : >> { %v439_v32 = vsel %vm386_vm2, %v434_v31, 0  ;;  %s594_s17 = sshll.u32 (%p243_p11), %s834_s22, 7  ;;  %s504_s30 = sshll.u32 (%p243_p11), %s215_s14, 4  ;;  %s505_s30 = int_to_ptr.vmem [resolvable:$true] %s504_s30 }
  0xc4   : > { %s930_s26 = scalar_lea.hbm (%p243_p11), %s976_s5, %s594_s17  ;;  %s491_s15 = scalar_lea.sflag (%p243_p11), [#allocation3], %s213_s10 }
  0xc5   : >> { %610 = vmatpush3.bf16.msra.mxu0 %v695_v19  ;;  %s700_s6 = scalar_lea.vmem (%p243_p11), %s505_s30, 128 }
  0xc6   : >> { %621 = vmatprep.subr.bf16.mxu0 %v778_v17  ;;  %p701_p12 = scmp.ne.s32.totalorder (%p243_p11), %s505_s30, %s700_s6 }
  0xc8   : >> { %612 = vmatmul.mubr.msk.bf16.vlgmr.msra.gmra.mxu0 %vm223_vm0, %v240_v15  ;;  %p702_p13 = pnand (%p243_p11), %p701_p12, %p851_p5 }
  0xc9   : >> { %623 = vmatprep.mubr.msk.bf16.mxu0 %vm779_vm1, %v778_v17 }
  0xca   : > { %p703_p0 = pneg (%p243_p11), %p702_p13 }
 0x188   : >> { %v312_v21 = vpop.f32.mrf.mxu0 }
 0x189   : >> { %v313_v22 = vadd.f32 %v584_v20, %v312_v21 }
 0x18a   : >> { %v613_v23 = vpop.f32.mrf.mxu0 }
 0x18b   : >> { %v318_v24 = vpack.c.bf16 %v313_v22, %v313_v22 }
 0x18c   : >> { %v315_v25 = vpop.f32.mrf.mxu0 }
 0x18d   : >> { %381 = vrot.lane.b32.xlu1 %v318_v24, %s780_s7  ;;  %320 = vrot.lane.b32.xlu0 %v318_v24, %s781_s8  ;;  %s782_s7 = smov (%p243_p11), [#allocation2]  }
 0x18e   : >> { %v614_v26 = vpop.f32.mrf.mxu0  ;;  %s704_s8 = sshll.u32 (%p243_p11), %s782_s7, 4  ;;  %s705_s8 = int_to_ptr.vmem [resolvable:$false] %s704_s8 }
 0x18f   : > { %s706_s22 = scalar_lea.vmem (%p243_p11), %s705_s8, 256  ;;  %p707_p1 = scmp.lt.s32.totalorder (%p243_p11), %s505_s30, %s705_s8 }
 0x190   : > { %p708_p2 = scmp.lt.s32.totalorder (%p243_p11), %s706_s22, %s700_s6 }
 0x192   : > { %p709_p3 = por (%p243_p11), %p708_p2, %p707_p1 }
 0x194   : > { %p710_p4 = pnand (%p243_p11), %p709_p3, %p703_p0 }
 0x1ff   : >> { %v382_v27 = vpop.permute.xlu1 %381  ;;  %v321_v28 = vpop.permute.xlu0 %320 }
 0x200   : >> { %v388_v29 = vsel %vm386_vm2, %v382_v27, 0  ;;  %v327_v30 = vsel %vm322_vm3, %v321_v28, 0 }
 0x201   : >> { %616 = vmatpush3.bf16.xpose.msra.mxu1 %v327_v30  ;;  %622 = vmatpush3.bf16.msra.mxu0 %v388_v29 }
 0x202   : >> { %627 = vmatprep.subr.bf16.mxu1 %v778_v17 }
 0x208   : >> { %618 = vmatmul.mubr.msk.bf16.vlgmr.msra.gmra.mxu1 %vm322_vm3, %v318_v24 }
 0x209   : >> { %628 = vmatpush3.bf16.msra.mxu1 %v439_v32  ;;  %629 = vmatprep.mubr.msk.bf16.mxu1 %vm779_vm1, %v778_v17 }
 0x2c8   : >> { %v363_v33 = vpop.f32.mrf.mxu1 }
 0x2c9   : >> { %v369_v34 = vsel %vm322_vm3, %v363_v33, -inf }
 0x2ca   : >> { %370 = vmax.xlane.f32.xlu0 %v369_v34  ;;  %v619_v35 = vpop.f32.mrf.mxu1 }
 0x2cc   : >> { %v366_v36 = vpop.f32.mrf.mxu1 }
 0x2ce   : >> { %v620_v37 = vpop.f32.mrf.mxu1 }
 0x353   : >> { %v371_v38 = vpop.xlane.xlu0 %370 }
 0x354   : >> { %v372_v39 = vsub.f32 %v363_v33, %v371_v38 }
 0x356   : >> { %v373_v40 = vmul.f32 1.442695, %v372_v39 }
 0x358   : >> { %696 = vpow2.f32 %v373_v40 }
 0x365   : >> { %v697_v41 = vpop.eup %696 }
 0x366   : >> { %v375_v42 = vsel %vm322_vm3, %v697_v41, 0.0  ;;  %v380_v43 = vpack.c.bf16 %v697_v41, %v697_v41 }
 0x367   : >> { %376 = vadd.xlane.f32.xlu1 %v375_v42 }
 0x368   : >> { %624 = vmatmul.mubr.msk.bf16.vlgmr.msra.gmra.mxu0 %vm322_vm3, %v380_v43 }
 0x3f0   : >> { %v377_v44 = vpop.xlane.xlu1 %376 }
 0x3f1   : >> { %698 = vrcp.f32 %v377_v44 }
 0x3fe   : >> { %v699_v45 = vpop.eup %698 }
 0x428   : >> { %v424_v46 = vpop.f32.mrf.mxu0 }
 0x429   : >> { %v430_v47 = vmul.f32 %v699_v45, %v424_v46 }
 0x42a   : >> { %v625_v48 = vpop.f32.mrf.mxu0 }
 0x42b   : >> { %v431_v49 = vpack.c.bf16 %v430_v47, %v430_v47 }
 0x42c   : >> { %v427_v50 = vpop.f32.mrf.mxu0 }
 0x42d   : >> { %630 = vmatmul.mubr.msk.bf16.vlgmr.msra.gmra.mxu1 %vm322_vm3, %v431_v49 }
 0x42e   : >> { %v626_v51 = vpop.f32.mrf.mxu0 }
 0x4ed   : >> { %v475_v52 = vpop.f32.mrf.mxu1 }
 0x4ee   : >> { %v481_v53 = vadd.f32 %v772_v16, %v475_v52  }
 0x4ef   : >> { %v631_v54 = vpop.f32.mrf.mxu1  ;;  %245 = sbr.rel (!%p243_p11) target bundleno = 190 (0xbe), region = 85 }
 0x4f0   : >> { %v979_v16 = vmov %v481_v53  ;;  %v488_v57 = vadd.f32 (%p243_p11), %v876_v4, %v481_v53 }
 0x4f1   : >> { %v478_v55 = vpop.f32.mrf.mxu1 }
 0x4f2   : > { %489 = vst [vmem:[%s215_s14] sm:$0xff] (%p243_p11), %v488_v57 }
 0x4f3   : >> { %v632_v56 = vpop.f32.mrf.mxu1 }
 0x4f4   : > { %713 = shalt.err (!%p710_p4)
}
 0x4f5   : > { %s714_s11 = scalar_lea.hbm %s930_s26, 128  ;;  %s718_s9 = scalar_lea.hbm %s976_s5, 256 }
 0x4f6   : > { %p715_p7 = scmp.ne.s32.totalorder %s930_s26, %s714_s11  ;;  %p719_p10 = scmp.lt.s32.totalorder %s930_s26, %s976_s5 }
 0x4f7   : > { %p720_p11 = scmp.lt.s32.totalorder %s718_s9, %s714_s11 }
 0x4f8   : > { %p716_p8 = pnand %p715_p7, %p851_p5 }
 0x4f9   : > { %p721_p12 = por %p720_p11, %p719_p10 }
 0x4fa   : > { %p717_p9 = pneg %p716_p8 }
 0x4fc   : > { %p722_p13 = pnand %p721_p12, %p717_p9 }
 0x4fe   : > { %725 = shalt.err (!%p722_p13)
}
 0x4ff   : > { %633 = dma.vmem_to_hbm [thread:$0]  (%p851_p5), %s505_s30, 128, %s930_s26, %s491_s15  }
 0x500 PF: > { %p639_p0 = scmp.ge.s32.totalorder %s768_s21, 2  ;;  %s516_s16 = sand.u32 1, %s756_s18  }
 0x501   : > { %s517_s17 = scalar_lea.sflag [#allocation3], %s516_s16 }
 0x502   : > { %p636_p1 = pnand %p639_p0, %p855_p6 }
 0x504   : > { %p637_p2 = pneg %p636_p1 }
 0x506   : > { %751 = dma.done.wait (%p637_p2), %s517_s17, 128  }
 0x507   : > { %753 = vsyncadd (%p637_p2), %s517_s17, 4294967168  ;;  %p15_p3 = scmp.ge.s32.totalorder %s838_s24, 4   ;;  %s980_s18 = smov %s760_s19 }
 0x508   : > { %s981_s19 = smov %s764_s20  ;;  %s982_s20 = smov %s849_s27 }
 0x509   : > { %s983_s21 = smov %s838_s24  ;;  %17 = sbr.rel (!%p15_p3) target bundleno = 3 (0x3), region = 96 }
 0x50e   :  { %522 = vsyncpa [#allocation3], 1 }
 0x50f   :  { %524 = vsyncpa [#allocation3 + $0x1], 1 }

</bundles_post_ra>
